<compile_context>
chip_gen: v7x
topology: tpu7x:2x2x1
jax: 0.10.0
libtpu: 0.0.40
codegen_flags: <defaults>
</compile_context>

<pallas_src>
import jax
import jax.numpy as jnp
from jax.experimental import pallas as pl
from jax.experimental.pallas import tpu as pltpu

_LANE = 128
_SUBLANE = 8


def _round_up(x, m):
    return ((x + m - 1) // m) * m


def valuenet_kernel(obs_ref, w_in_ref, b_in_ref, w_h_ref, b_h_ref,
                    w_out_ref, b_out_ref, out_ref):
    # obs_ref  : (TB, n_obs)    f32  -- streamed per grid step
    # w_in_ref : (n_obs, H_p)   bf16 -- resident, single-buffered
    # b_in_ref : (1, H_p)       f32  -- lane-dense row
    # w_h_ref  : (L, H_p, H_p)  bf16 -- resident hidden-layer stack
    # b_h_ref  : (L, 1, H_p)    f32  -- lane-dense rows
    # w_out_ref: (1, H_p)       bf16 -- output weights stored as a row
    # b_out_ref: (1, 1)         f32
    # out_ref  : (1, TB)        f32  -- lane-dense output row
    x = obs_ref[...].astype(jnp.bfloat16)          # in-kernel cast (VPU)

    # Input layer: (TB, n_obs) @ (n_obs, H_p); bias + ReLU + bf16 cast fused.
    h = jnp.dot(x, w_in_ref[...], preferred_element_type=jnp.float32)
    h = jnp.maximum(h + b_in_ref[...], 0.0).astype(jnp.bfloat16)

    # Hidden layers (L is a small compile-time constant -> static unroll).
    # TODO(synk): switch to lax.fori_loop indexing w_h_ref[l] if L grows large.
    for l in range(w_h_ref.shape[0]):
        h = jnp.dot(h, w_h_ref[l], preferred_element_type=jnp.float32)
        h = jnp.maximum(h + b_h_ref[l], 0.0).astype(jnp.bfloat16)

    # Single aligned bf16 transpose so the output matmul is already lane-dense.
    h_t = h.T                                      # (H_p, TB)
    o = jnp.dot(w_out_ref[...], h_t, preferred_element_type=jnp.float32)
    # Trailing ReLU matches the original module's forward.
    out_ref[...] = jnp.maximum(o + b_out_ref[...], 0.0).astype(out_ref.dtype)


def prepare_params(params):
    """One-time prep: zero-pad hidden width to 128, cast weights to bf16.

    n_obs stays at its natural size (full-dim block exception), biases stay
    lane-dense (1, H_p) rows, and the output weights become a (1, H_p) row.
    """
    w_in, b_in = params["w_in"], params["b_in"]        # (n_obs, H), (1, H)
    w_h, b_h = params["w_h"], params["b_h"]            # (L, H, H), (L, 1, H)
    w_out, b_out = params["w_out"], params["b_out"]    # (H, 1), (1, 1)

    n_obs, H = w_in.shape
    H_p = _round_up(H, _LANE)
    padH = H_p - H

    return {
        "w_in":      jnp.pad(w_in, ((0, 0), (0, padH))).astype(jnp.bfloat16),
        "b_in":      jnp.pad(b_in, ((0, 0), (0, padH))).astype(jnp.float32),
        "w_h":       jnp.pad(w_h, ((0, 0), (0, padH), (0, padH))).astype(jnp.bfloat16),
        "b_h":       jnp.pad(b_h, ((0, 0), (0, 0), (0, padH))).astype(jnp.float32),
        "w_out_row": jnp.pad(w_out.T, ((0, 0), (0, padH))).astype(jnp.bfloat16),
        "b_out":     b_out.reshape(1, 1).astype(jnp.float32),
    }


def value_net_forward(obs, prepped, *, batch_tile=512):
    """obs: (B, n_obs) float32.  prepped: output of prepare_params.  Returns (B, 1) f32."""
    assert batch_tile % _LANE == 0, "batch_tile must be a multiple of 128"
    B, n_obs = obs.shape
    n_obs_w, H_p = prepped["w_in"].shape
    assert n_obs == n_obs_w, "obs feature dim does not match prepared params"
    L = prepped["w_h"].shape[0]

    # Batch tiling: large tiles amortize the ~0.35us per-step overhead, but cap
    # so tiny batches do not over-allocate and the grid keeps >= 2 steps when
    # possible (v7x shards "parallel" grid axes across its 2 TensorCores).
    if B > _LANE:
        bt = min(batch_tile, _round_up(pl.cdiv(B, 2), _LANE))
    else:
        bt = _LANE
    grid = (pl.cdiv(B, bt),)

    # Advisory cost estimate for XLA scheduling around the custom call.
    rows = grid[0] * bt
    flops = 2 * rows * (n_obs * H_p + L * H_p * H_p + H_p)
    bytes_accessed = int(B * n_obs * 4 + B * 4
                         + prepped["w_in"].size * 2 + prepped["w_h"].size * 2
                         + prepped["w_out_row"].size * 2
                         + (prepped["b_in"].size + prepped["b_h"].size + 1) * 4)

    # VMEM budget: double-buffered streamed blocks + single-buffered resident
    # weights + activation scratch + headroom, clamped to the device VMEM.
    obs_blk = 2 * bt * _round_up(n_obs, _LANE) * 4      # streamed obs tiles (lane-padded)
    out_blk = 2 * _SUBLANE * bt * 4                     # streamed (1, bt) output rows
    w_bytes = (_round_up(n_obs, 16) * H_p * 2           # w_in  (bf16, Buffered(1))
               + L * H_p * H_p * 2                      # hidden-layer stack
               + 16 * H_p * 2)                          # w_out row (sublane-padded)
    b_bytes = (L + 1) * _SUBLANE * H_p * 4 + _SUBLANE * _LANE * 4
    act_bytes = bt * H_p * (4 + 2 + 2)                  # f32 acc + bf16 act + transposed copy
    vmem_needed = obs_blk + out_blk + w_bytes + b_bytes + act_bytes + (4 << 20)
    try:
        device_vmem = int(pltpu.get_tpu_info().vmem_capacity_bytes)
    except Exception:
        device_vmem = 64 << 20                          # conservative: v7x per-TensorCore VMEM
    vmem_limit = max(16 << 20, min(int(vmem_needed), device_vmem - (2 << 20)))

    # Constant-index_map blocks are fetched once -> single-buffer them.
    resident = lambda shape, imap: pl.BlockSpec(shape, imap,
                                                pipeline_mode=pl.Buffered(1))

    out_row = pl.pallas_call(
        valuenet_kernel,
        out_shape=jax.ShapeDtypeStruct((1, B), jnp.float32),
        grid_spec=pltpu.PrefetchScalarGridSpec(
            num_scalar_prefetch=0,
            grid=grid,
            in_specs=[
                pl.BlockSpec((bt, n_obs), lambda i: (i, 0)),    # obs tile (streamed, f32)
                resident((n_obs, H_p), lambda i: (0, 0)),       # w_in
                resident((1, H_p), lambda i: (0, 0)),           # b_in  (lane-dense)
                resident((L, H_p, H_p), lambda i: (0, 0, 0)),   # hidden W stack
                resident((L, 1, H_p), lambda i: (0, 0, 0)),     # hidden b stack (lane-dense)
                resident((1, H_p), lambda i: (0, 0)),           # w_out row
                resident((1, 1), lambda i: (0, 0)),             # b_out
            ],
            out_specs=pl.BlockSpec((1, bt), lambda i: (0, i)),  # lane-dense output row
        ),
        compiler_params=pltpu.CompilerParams(
            dimension_semantics=("parallel",),
            vmem_limit_bytes=vmem_limit),
        cost_estimate=pl.CostEstimate(flops=flops, transcendentals=0,
                                      bytes_accessed=bytes_accessed),
    )(obs, prepped["w_in"], prepped["b_in"], prepped["w_h"], prepped["b_h"],
      prepped["w_out_row"], prepped["b_out"])

    # (1, B) row-major is the same contiguous vector as (B, 1): free reshape.
    return out_row.reshape(B, 1)


def init_params(key, n_observations, n_layers, hsize):
    """Deterministic init mimicking PyTorch Linear default: U(-1/sqrt(fan_in), 1/sqrt(fan_in))."""
    ks = jax.random.split(key, 6)

    def uniform(k, shape, fan_in):
        bound = 1.0 / jnp.sqrt(jnp.float32(fan_in))
        return jax.random.uniform(k, shape, jnp.float32, -bound, bound)

    return {
        "w_in": uniform(ks[0], (n_observations, hsize), n_observations),
        "b_in": uniform(ks[1], (1, hsize), n_observations),
        "w_h": uniform(ks[2], (n_layers, hsize, hsize), hsize),
        "b_h": uniform(ks[3], (n_layers, 1, hsize), hsize),
        "w_out": uniform(ks[4], (hsize, 1), hsize),
        "b_out": uniform(ks[5], (1, 1), hsize),
    }


def value_net_ref(obs, params, *, compute_dtype=jnp.float32):
    """Pure-JAX reference. compute_dtype=bfloat16 mirrors the kernel's matmul precision."""
    c = lambda a: a.astype(compute_dtype)
    h = jnp.maximum(jnp.dot(c(obs), c(params["w_in"]),
                            preferred_element_type=jnp.float32) + params["b_in"], 0.0)
    for l in range(params["w_h"].shape[0]):
        h = jnp.maximum(jnp.dot(c(h), c(params["w_h"][l]),
                                preferred_element_type=jnp.float32) + params["b_h"][l], 0.0)
    return jnp.maximum(jnp.dot(c(h), c(params["w_out"]),
                               preferred_element_type=jnp.float32) + params["b_out"], 0.0)


if __name__ == "__main__":
    # Small shapes consistent with the module: obs dim 16, 2 hidden layers, hsize 32.
    n_observations, n_layers, hsize = 16, 2, 32
    batch = 200  # NOT a multiple of the batch tile -> exercises the partial-block path

    key = jax.random.PRNGKey(0)
    k_params, k_obs = jax.random.split(key)
    params = init_params(k_params, n_observations, n_layers, hsize)
    obs = jax.random.normal(k_obs, (batch, n_observations), jnp.float32)

    prepped = prepare_params(params)
    out = jax.block_until_ready(value_net_forward(obs, prepped))

    ref = value_net_ref(obs, params, compute_dtype=jnp.bfloat16)
    assert out.shape == (batch, 1)
    max_err = float(jnp.max(jnp.abs(out - ref)))
    assert jnp.allclose(out, ref, atol=1e-2, rtol=1e-2), \
        f"mismatch vs reference, max abs err {max_err}"

    print("KERNEL_OK")
</pallas_src>

<mosaic_0001>
module attributes {stable_mosaic.version = 11 : i64} {
  func.func @valuenet_kernel(%arg0: i32, %arg1: memref<128x16xf32, #tpu.memory_space<vmem>>, %arg2: memref<16x128xbf16, #tpu.memory_space<vmem>>, %arg3: memref<1x128xf32, #tpu.memory_space<vmem>>, %arg4: memref<2x128x128xbf16, #tpu.memory_space<vmem>>, %arg5: memref<2x1x128xf32, #tpu.memory_space<vmem>>, %arg6: memref<1x128xbf16, #tpu.memory_space<vmem>>, %arg7: memref<1x1xf32, #tpu.memory_space<vmem>>, %arg8: memref<1x128xf32, #tpu.memory_space<vmem>>) attributes {dimension_semantics = [#tpu.dimension_semantics<parallel>], iteration_bounds = array<i64: 2>, scalar_prefetch = 0 : i64, scratch_operands = 0 : i64, tpu.core_type = #tpu.core_type<tc>, window_params = [{transform_indices = @transform_0, window_bounds = array<i64: 128, 16>}, {pipeline_mode = #tpu.pipeline_mode<synchronous>, transform_indices = @transform_1, window_bounds = array<i64: 16, 128>}, {pipeline_mode = #tpu.pipeline_mode<synchronous>, transform_indices = @transform_2, window_bounds = array<i64: 1, 128>}, {pipeline_mode = #tpu.pipeline_mode<synchronous>, transform_indices = @transform_3, window_bounds = array<i64: 2, 128, 128>}, {pipeline_mode = #tpu.pipeline_mode<synchronous>, transform_indices = @transform_4, window_bounds = array<i64: 2, 1, 128>}, {pipeline_mode = #tpu.pipeline_mode<synchronous>, transform_indices = @transform_5, window_bounds = array<i64: 1, 128>}, {pipeline_mode = #tpu.pipeline_mode<synchronous>, transform_indices = @transform_6, window_bounds = array<i64: 1, 1>}, {transform_indices = @transform_7, window_bounds = array<i64: 1, 128>}]} {
    %c0 = arith.constant 0 : index
    %c0_0 = arith.constant 0 : index
    %0 = vector.load %arg1[%c0, %c0_0] : memref<128x16xf32, #tpu.memory_space<vmem>>, vector<128x16xf32>
    %1 = arith.truncf %0 : vector<128x16xf32> to vector<128x16xbf16>
    %c0_1 = arith.constant 0 : index
    %c0_2 = arith.constant 0 : index
    %2 = vector.load %arg2[%c0_1, %c0_2] : memref<16x128xbf16, #tpu.memory_space<vmem>>, vector<16x128xbf16>
    %cst = arith.constant dense<0.000000e+00> : vector<128x128xf32>
    %3 = tpu.matmul %1, %2, %cst {dimension_numbers = #tpu.dot_dimension_numbers<[1], [0], [0], [1], [0, 0, 1, 1], [], []>} : vector<128x16xbf16>, vector<16x128xbf16>, vector<128x128xf32> -> vector<128x128xf32>
    %c0_3 = arith.constant 0 : index
    %c0_4 = arith.constant 0 : index
    %4 = vector.load %arg3[%c0_3, %c0_4] : memref<1x128xf32, #tpu.memory_space<vmem>>, vector<1x128xf32>
    %5 = vector.broadcast %4 : vector<1x128xf32> to vector<128x128xf32>
    %6 = arith.addf %3, %5 : vector<128x128xf32>
    %cst_5 = arith.constant 0.000000e+00 : f32
    %7 = vector.broadcast %cst_5 : f32 to vector<128x128xf32>
    %8 = arith.maximumf %6, %7 : vector<128x128xf32>
    %9 = arith.truncf %8 : vector<128x128xf32> to vector<128x128xbf16>
    %c0_6 = arith.constant 0 : index
    %c0_7 = arith.constant 0 : index
    %c0_8 = arith.constant 0 : index
    %10 = vector.load %arg4[%c0_6, %c0_7, %c0_8] : memref<2x128x128xbf16, #tpu.memory_space<vmem>>, vector<1x128x128xbf16>
    %11 = vector.shape_cast %10 : vector<1x128x128xbf16> to vector<128x128xbf16>
    %cst_9 = arith.constant dense<0.000000e+00> : vector<128x128xf32>
    %12 = tpu.matmul %9, %11, %cst_9 {dimension_numbers = #tpu.dot_dimension_numbers<[1], [0], [0], [1], [0, 0, 1, 1], [], []>} : vector<128x128xbf16>, vector<128x128xbf16>, vector<128x128xf32> -> vector<128x128xf32>
    %c0_10 = arith.constant 0 : index
    %c0_11 = arith.constant 0 : index
    %c0_12 = arith.constant 0 : index
    %13 = vector.load %arg5[%c0_10, %c0_11, %c0_12] : memref<2x1x128xf32, #tpu.memory_space<vmem>>, vector<1x1x128xf32>
    %14 = vector.shape_cast %13 : vector<1x1x128xf32> to vector<1x128xf32>
    %15 = vector.broadcast %14 : vector<1x128xf32> to vector<128x128xf32>
    %16 = arith.addf %12, %15 : vector<128x128xf32>
    %cst_13 = arith.constant 0.000000e+00 : f32
    %17 = vector.broadcast %cst_13 : f32 to vector<128x128xf32>
    %18 = arith.maximumf %16, %17 : vector<128x128xf32>
    %19 = arith.truncf %18 : vector<128x128xf32> to vector<128x128xbf16>
    %c1 = arith.constant 1 : index
    %c0_14 = arith.constant 0 : index
    %c0_15 = arith.constant 0 : index
    %20 = vector.load %arg4[%c1, %c0_14, %c0_15] : memref<2x128x128xbf16, #tpu.memory_space<vmem>>, vector<1x128x128xbf16>
    %21 = vector.shape_cast %20 : vector<1x128x128xbf16> to vector<128x128xbf16>
    %cst_16 = arith.constant dense<0.000000e+00> : vector<128x128xf32>
    %22 = tpu.matmul %19, %21, %cst_16 {dimension_numbers = #tpu.dot_dimension_numbers<[1], [0], [0], [1], [0, 0, 1, 1], [], []>} : vector<128x128xbf16>, vector<128x128xbf16>, vector<128x128xf32> -> vector<128x128xf32>
    %c1_17 = arith.constant 1 : index
    %c0_18 = arith.constant 0 : index
    %c0_19 = arith.constant 0 : index
    %23 = vector.load %arg5[%c1_17, %c0_18, %c0_19] : memref<2x1x128xf32, #tpu.memory_space<vmem>>, vector<1x1x128xf32>
    %24 = vector.shape_cast %23 : vector<1x1x128xf32> to vector<1x128xf32>
    %25 = vector.broadcast %24 : vector<1x128xf32> to vector<128x128xf32>
    %26 = arith.addf %22, %25 : vector<128x128xf32>
    %cst_20 = arith.constant 0.000000e+00 : f32
    %27 = vector.broadcast %cst_20 : f32 to vector<128x128xf32>
    %28 = arith.maximumf %26, %27 : vector<128x128xf32>
    %29 = arith.truncf %28 : vector<128x128xf32> to vector<128x128xbf16>
    %30 = tpu.transpose %29, [1, 0] : vector<128x128xbf16> -> vector<128x128xbf16>
    %c0_21 = arith.constant 0 : index
    %c0_22 = arith.constant 0 : index
    %31 = vector.load %arg6[%c0_21, %c0_22] : memref<1x128xbf16, #tpu.memory_space<vmem>>, vector<1x128xbf16>
    %cst_23 = arith.constant dense<0.000000e+00> : vector<1x128xf32>
    %32 = tpu.matmul %31, %30, %cst_23 {dimension_numbers = #tpu.dot_dimension_numbers<[1], [0], [0], [1], [0, 0, 1, 1], [], []>} : vector<1x128xbf16>, vector<128x128xbf16>, vector<1x128xf32> -> vector<1x128xf32>
    %c0_24 = arith.constant 0 : index
    %c0_25 = arith.constant 0 : index
    %33 = vector.load %arg7[%c0_24, %c0_25] : memref<1x1xf32, #tpu.memory_space<vmem>>, vector<1x1xf32>
    %34 = vector.broadcast %33 : vector<1x1xf32> to vector<1x128xf32>
    %35 = arith.addf %32, %34 : vector<1x128xf32>
    %cst_26 = arith.constant 0.000000e+00 : f32
    %36 = vector.broadcast %cst_26 : f32 to vector<1x128xf32>
    %37 = arith.maximumf %35, %36 : vector<1x128xf32>
    %c0_27 = arith.constant 0 : index
    %c0_28 = arith.constant 0 : index
    %38 = vector.load %arg8[%c0_27, %c0_28] : memref<1x128xf32, #tpu.memory_space<vmem>>, vector<1x128xf32>
    tpu.vector_store %arg8[%c0_27, %c0_28], %37 {strides = array<i32>} : memref<1x128xf32, #tpu.memory_space<vmem>>, vector<1x128xf32>,
    return
  }
  func.func @transform_0(%arg0: i32) -> (i32, i32) {
    %c0_i32 = arith.constant 0 : i32
    %c0_i32_0 = arith.constant 0 : i32
    return %arg0, %c0_i32 : i32, i32
  }
  func.func @transform_1(%arg0: i32) -> (i32, i32) {
    %c0_i32 = arith.constant 0 : i32
    %c0_i32_0 = arith.constant 0 : i32
    %c0_i32_1 = arith.constant 0 : i32
    return %c0_i32, %c0_i32_0 : i32, i32
  }
  func.func @transform_2(%arg0: i32) -> (i32, i32) {
    %c0_i32 = arith.constant 0 : i32
    %c0_i32_0 = arith.constant 0 : i32
    %c0_i32_1 = arith.constant 0 : i32
    return %c0_i32, %c0_i32_0 : i32, i32
  }
  func.func @transform_3(%arg0: i32) -> (i32, i32, i32) {
    %c0_i32 = arith.constant 0 : i32
    %c0_i32_0 = arith.constant 0 : i32
    %c0_i32_1 = arith.constant 0 : i32
    %c0_i32_2 = arith.constant 0 : i32
    return %c0_i32, %c0_i32_0, %c0_i32_1 : i32, i32, i32
  }
  func.func @transform_4(%arg0: i32) -> (i32, i32, i32) {
    %c0_i32 = arith.constant 0 : i32
    %c0_i32_0 = arith.constant 0 : i32
    %c0_i32_1 = arith.constant 0 : i32
    %c0_i32_2 = arith.constant 0 : i32
    return %c0_i32, %c0_i32_0, %c0_i32_1 : i32, i32, i32
  }
  func.func @transform_5(%arg0: i32) -> (i32, i32) {
    %c0_i32 = arith.constant 0 : i32
    %c0_i32_0 = arith.constant 0 : i32
    %c0_i32_1 = arith.constant 0 : i32
    return %c0_i32, %c0_i32_0 : i32, i32
  }
  func.func @transform_6(%arg0: i32) -> (i32, i32) {
    %c0_i32 = arith.constant 0 : i32
    %c0_i32_0 = arith.constant 0 : i32
    %c0_i32_1 = arith.constant 0 : i32
    return %c0_i32, %c0_i32_0 : i32, i32
  }
  func.func @transform_7(%arg0: i32) -> (i32, i32) {
    %c0_i32 = arith.constant 0 : i32
    %c0_i32_0 = arith.constant 0 : i32
    return %c0_i32, %arg0 : i32, i32
  }
}

</mosaic_0001>

<bundles_post_ra>
// kernel: tpu_custom_call.1
= control target key start
LH: loop header
LB: loop body
LE: loop exit
PB: predicated region body
PF: predicated region fallthrough
CT: control target
= control target key end

     0   :  { %s1585_s0 = inlined_call_operand.vmem [shape: f32[200,16], index: 0, kind: input, shape index: {}]   ;;  %s1586_s1 = inlined_call_operand.vmem [shape: bf16[16,128], index: 1, kind: input, shape index: {}]   ;;  %s1587_s2 = inlined_call_operand.vmem [shape: f32[1,128], index: 2, kind: input, shape index: {}]   ;;  %s1588_s3 = inlined_call_operand.vmem [shape: bf16[2,128,128], index: 3, kind: input, shape index: {}]   ;;  %s1589_s4 = inlined_call_operand.vmem [shape: f32[2,1,128], index: 4, kind: input, shape index: {}]   ;;  %s1590_s5 = inlined_call_operand.vmem [shape: bf16[1,128], index: 5, kind: input, shape index: {}]   ;;  %s1591_s6 = inlined_call_operand.<no memory space> [shape: f32[1,1], index: 6, kind: input, shape index: {}]   ;;  %s1592_s7 = inlined_call_operand.hbm [shape: f32[1,200], index: 7, kind: output, shape index: {}]  }
   0x1   :  { %v12_v0 = vstv %s1591_s6 }
   0x2   :  { %13 = vst [vmem:[#allocation2] sm:$0x1] %v12_v0 }
   0x3   :  { %14 = vsyncpa [#allocation4], 0 }
   0x4   :  { %16 = vsyncpa [#allocation4 + $0x1], 0  ;;  %s1370_s26 = smov 0   ;;  %s1372_s27 = smov 0  }
   0x5   :  { %s1374_s28 = smov 0   ;;  %s1376_s29 = smov 0  }
   0x6 LB: > { %s992_s6 = sadd.s32 4294967295, %s1321_s29   ;;  %s993_s30 = sadd.s32 4294967294, %s1321_s29   ;;  %s1321_s29 = sphi %s1376_s29, %s1598_s29   ;;  %s1317_s28 = sphi %s1374_s28, %s1597_s28   ;;  %s1313_s27 = sphi %s1372_s27, %s1596_s27   ;;  %s1309_s26 = sphi %s1370_s26, %s1595_s26  }
   0x7   : > { %s1393_s8 = sadd.s32 1, %s1321_s29   ;;  %s181_s9 = sadd.s32 1, %s1317_s28 }
   0x8   : > { %s178_s10 = ssub.s32 %s1321_s29, %s1393_s8  ;;  %p191_p0 = scmp.ne.s32.totalorder %s1317_s28, %s1313_s27 }
   0x9   : > { %p179_p1 = scmp.eq.s32.totalorder %s178_s10, 0  ;;  %p192_p2 = scmp.eq.s32.totalorder %s992_s6, 1 }
   0xa   : > { %p197_p3 = scmp.ne.s32.totalorder %s1313_s27, %s1309_s26  ;;  %p198_p4 = scmp.eq.s32.totalorder %s993_s30, 1 }
   0xb   : > { %s1403_s11 = scalar_select %p179_p1, %s1317_s28, %s181_s9  }
   0xc   : > { %p1405_p5 = por %p192_p2, %p191_p0  ;;  %p1409_p6 = por %p198_p4, %p197_p3 }
   0xd   : > { %p996_p7 = scmp.ge.s32.totalorder %s1321_s29, 1  ;;  %p251_p8 = scmp.lt.s32.totalorder %s1321_s29, 3 }
   0xf   : > { %p252_p9 = pnand %p996_p7, %p251_p8 }
  0x10   : > { %v1242_v1 = vld [vmem:[%s1586_s1] sm:$0xff] (!%p252_p9)   ;;  %s1418_s16 = sshll.u32 (!%p252_p9), %s992_s6, 4  ;;  %v1244_v3 = vld [vmem:[%s1588_s3 + $0x8] sm:$0xff] (!%p252_p9)   ;;  %v1245_v4 = vld [vmem:[%s1588_s3 + $0x10] sm:$0xff] (!%p252_p9)   ;;  %vm340_vm0 = vcmask (!%p252_p9), 130048   ;;  %vm1324_vm1 = vmmov (!%p252_p9), 0  }
  0x11   : > { %255 = sbr.rel (%p252_p9) target bundleno = 990 (0x3de), region = 48  ;;  %p291_p10 = scmp.lt.s32.totalorder (!%p252_p9), %s1418_s16, 24  ;;  %1097 = vmatprep.subr.bf16.mxu1 (!%p252_p9), %v1242_v1  ;;  %v1243_v2 = vld [vmem:[%s1588_s3] sm:$0xff] (!%p252_p9)   ;;  %v1246_v14 = vld [vmem:[%s1588_s3 + $0x18] sm:$0xff] (!%p252_p9)   ;;  %v1248_v22 = vld [vmem:[%s1588_s3 + $0x28] sm:$0xff] (!%p252_p9)  }
  0x12   : > { %1098 = vmatpush3.bf16.msra.mxu1 (!%p252_p9), %v1242_v1  ;;  %1115 = vmatprep.subr.bf16.mxu0 (!%p252_p9), %v1243_v2  ;;  %v1247_v19 = vld [vmem:[%s1588_s3 + $0x20] sm:$0xff] (!%p252_p9)   ;;  %v1249_v32 = vld [vmem:[%s1588_s3 + $0x30] sm:$0xff] (!%p252_p9)   ;;  %v1250_v33 = vld [vmem:[%s1588_s3 + $0x38] sm:$0xff] (!%p252_p9)   ;;  %s284_s17 = sand.u32 (!%p252_p9), 1, %s1313_s27  }
  0x13   : > { %1116 = vmatpush3.bf16.msra.mxu0 (!%p252_p9), %v1243_v2  ;;  %v1251_v34 = vld [vmem:[%s1588_s3 + $0x40] sm:$0xff] (!%p252_p9)   ;;  %v1252_v53 = vld [vmem:[%s1588_s3 + $0x48] sm:$0xff] (!%p252_p9)   ;;  %v1253_v62 = vld [vmem:[%s1588_s3 + $0x50] sm:$0xff] (!%p252_p9)   ;;  %s285_s18 = scalar_lea.vmem (!%p252_p9), [#allocation3], %s284_s17  ;;  %s926_s23 = scalar_lea.sflag (!%p252_p9), [#allocation4], %s284_s17 }
  0x14   : > { %1117 = vmatprep.subr.bf16.mxu0 (!%p252_p9), %v1244_v3  ;;  %v1481_v35 = vld [vmem:[%s1587_s2] ss:$0 sm:$0xff] (!%p252_p9) }
  0x17   : > { %1118 = vmatpush3.bf16.msra.mxu0 (!%p252_p9), %v1244_v3 }
  0x18   : > { %s292_s19 = scalar_select %p291_p10, %s1418_s16, 24  ;;  %1119 = vmatprep.subr.bf16.mxu0 %v1245_v4 }
  0x1a   : > { %s998_s22 = sshll.u32 %s292_s19, 3  ;;  %s938_s19 = sshll.u32 %s285_s18, 4  ;;  %s1545_s19 = int_to_ptr.vmem [resolvable:$true] %s938_s19 }
  0x1b   : > { %s1431_s25 = scalar_lea.vmem %s1585_s0, %s998_s22  ;;  %1120 = vmatpush3.bf16.msra.mxu0 %v1245_v4  ;;  %s1543_s22 = scalar_lea.hbm %s1592_s7, %s1418_s16 }
  0x1c   : > { %v301_v5 = vld [vmem:[%s1431_s25] sm:$0xff]  ;;  %v302_v6 = vld [vmem:[%s1431_s25 + $0x8] sm:$0xff]  ;;  %v303_v7 = vld [vmem:[%s1431_s25 + $0x10] sm:$0xff]  ;;  %1121 = vmatprep.subr.bf16.mxu0 %v1246_v14  ;;  %s1259_s24 = scalar_lea.vmem %s1545_s19, 16 }
  0x1d   : > { %v317_v8 = vpack.c.bf16 %v302_v6, %v301_v5  ;;  %v304_v9 = vld [vmem:[%s1431_s25 + $0x18] sm:$0xff]  ;;  %v305_v10 = vld [vmem:[%s1431_s25 + $0x20] sm:$0xff]  ;;  %v306_v11 = vld [vmem:[%s1431_s25 + $0x28] sm:$0xff]  ;;  %p1260_p11 = scmp.ne.s32.totalorder %s1545_s19, %s1259_s24 }
  0x1e   : > { %v318_v12 = vpack.c.bf16 %v304_v9, %v303_v7  ;;  %v319_v13 = vpack.c.bf16 %v306_v11, %v305_v10  ;;  %v307_v15 = vld [vmem:[%s1431_s25 + $0x30] sm:$0xff]  ;;  %v308_v16 = vld [vmem:[%s1431_s25 + $0x38] sm:$0xff]  ;;  %v309_v17 = vld [vmem:[%s1431_s25 + $0x40] sm:$0xff] }
  0x1f   : > { %1099 = vmatprep.mubr.msk.bf16.mxu1 %vm340_vm0, %v317_v8  ;;  %v310_v18 = vld [vmem:[%s1431_s25 + $0x48] sm:$0xff]  ;;  %v320_v20 = vpack.c.bf16 %v308_v16, %v307_v15  ;;  %1122 = vmatpush3.bf16.msra.mxu0 %v1246_v14  ;;  %v311_v23 = vld [vmem:[%s1431_s25 + $0x50] sm:$0xff]  ;;  %v312_v24 = vld [vmem:[%s1431_s25 + $0x58] sm:$0xff]  ;;  %p1261_p12 = pnand %p1260_p11, %p1405_p5 }
  0x20   : > { %1100 = vmatmul.mubr.msk.bf16.vlgmr.msra.gmra.mrb[0].mxu1 %vm340_vm0, %v318_v12  ;;  %v321_v21 = vpack.c.bf16 %v310_v18, %v309_v17  ;;  %1123 = vmatprep.subr.bf16.mxu0 %v1247_v19  ;;  %v313_v25 = vld [vmem:[%s1431_s25 + $0x60] sm:$0xff]  ;;  %v314_v26 = vld [vmem:[%s1431_s25 + $0x68] sm:$0xff]  ;;  %v322_v27 = vpack.c.bf16 %v312_v24, %v311_v23  ;;  %v315_v29 = vld [vmem:[%s1431_s25 + $0x70] sm:$0xff] }
  0x21   : > { %1103 = vmatprep.mubr.msk.bf16.mxu1 %vm340_vm0, %v319_v13  ;;  %v323_v28 = vpack.c.bf16 %v314_v26, %v313_v25  ;;  %v316_v30 = vld [vmem:[%s1431_s25 + $0x78] sm:$0xff]  ;;  %v1255_v14 = vld [vmem:[%s1588_s3 + $0x60] sm:$0xff]   ;;  %p1262_p13 = pneg %p1261_p12  ;;  %s1326_s25 = smov [#allocation3]  }
  0x22   : > { %v324_v31 = vpack.c.bf16 %v316_v30, %v315_v29  ;;  %v1254_v5 = vld [vmem:[%s1588_s3 + $0x58] sm:$0xff]   ;;  %s1263_s6 = sshll.u32 %s1326_s25, 4  ;;  %s1264_s6 = int_to_ptr.vmem [resolvable:$false] %s1263_s6 }
  0x23   : > { %1124 = vmatpush3.bf16.msra.mxu0 %v1247_v19  ;;  %s1265_s30 = scalar_lea.vmem %s1264_s6, 32  ;;  %p1266_p0 = scmp.lt.s32.totalorder %s1545_s19, %s1264_s6 }
  0x24   : > { %1125 = vmatprep.subr.bf16.mxu0 %v1248_v22  ;;  %p1267_p1 = scmp.lt.s32.totalorder %s1265_s30, %s1259_s24 }
  0x26   : > { %p1268_p2 = por %p1267_p1, %p1266_p0 }
  0x27   : > { %1126 = vmatpush3.bf16.msra.mxu0 %v1248_v22 }
  0x28   : > { %1104 = vmatmul.mubr.msk.bf16.gmra.mrb[4].mxu1 %vm340_vm0, %v320_v20  ;;  %1127 = vmatprep.subr.bf16.mxu0 %v1249_v32  ;;  %p1269_p3 = pnand %p1268_p2, %p1262_p13 }
  0x29   : > { %1107 = vmatprep.mubr.msk.bf16.mxu1 %vm340_vm0, %v321_v21  ;;  %v1256_v21 = vld [vmem:[%s1588_s3 + $0x68] sm:$0xff]  }
  0x2b   : > { %1128 = vmatpush3.bf16.msra.mxu0 %v1249_v32 }
  0x2c   : > { %1129 = vmatprep.subr.bf16.mxu0 %v1250_v33 }
  0x2f   : > { %1130 = vmatpush3.bf16.msra.mxu0 %v1250_v33  ;;  %v1257_v33 = vld [vmem:[%s1588_s3 + $0x70] sm:$0xff]  }
  0x30   : > { %1108 = vmatmul.mubr.msk.bf16.gmra.mrb[8].mxu1 %vm340_vm0, %v322_v27  ;;  %1147 = vmatprep.subr.bf16.mxu0 %v1251_v34 }
  0x31   : > { %1111 = vmatprep.mubr.msk.bf16.mxu1 %vm340_vm0, %v323_v28 }
  0x38   : > { %1112 = vmatmul.mubr.msk.bf16.gmra.mrb[12].mxu1 %vm340_vm0, %v324_v31 }
  0xf3   : > { %v1101_v36 = vpop.f32.mrb[0].mxu1 }
  0xf4   : > { %v408_v37 = vadd.f32 %v1101_v36, %v1481_v35  ;;  %v399_v38 = vpop.f32.mrb[1].mxu1 }
  0xf5   : > { %v400_v39 = vadd.f32 %v1481_v35, %v399_v38  ;;  %v1102_v40 = vpop.f32.mrb[2].mxu1 }
  0xf6   : > { %v411_v41 = vadd.f32 %v1102_v40, %v1481_v35  ;;  %v402_v42 = vpop.f32.mrb[3].mxu1  ;;  %v464_v44 = vmax.f32 %v408_v37, 0.0 }
  0xf7   : > { %v403_v43 = vadd.f32 %v1481_v35, %v402_v42  ;;  %v462_v46 = vmax.f32 %v400_v39, 0.0 }
  0xf8   : > { %v465_v45 = vmax.f32 %v411_v41, 0.0 }
  0xf9   : > { %v463_v47 = vmax.f32 %v403_v43, 0.0 }
  0xfa   : > { %v479_v48 = vpack.c.bf16 %v465_v45, %v464_v44 }
  0xfb   : > { %v1105_v49 = vpop.f32.mrb[4].mxu1  ;;  %v478_v50 = vpack.c.bf16 %v463_v47, %v462_v46 }
  0xfc   : > { %v424_v51 = vadd.f32 %v1105_v49, %v1481_v35  ;;  %v415_v52 = vpop.f32.mrb[5].mxu1 }
  0xfd   : > { %v416_v54 = vadd.f32 %v1481_v35, %v415_v52  ;;  %v1106_v55 = vpop.f32.mrb[6].mxu1  ;;  %1131 = vmatprep.mubr.bf16.mxu0 %v478_v50 }
  0xfe   : > { %v468_v56 = vmax.f32 %v424_v51, 0.0  ;;  %v427_v57 = vadd.f32 %v1106_v55, %v1481_v35  ;;  %v418_v58 = vpop.f32.mrb[7].mxu1  ;;  %1132 = vmatmul.mubr.bf16.vlgmr.msra.gmra.mrb[0].mxu0 %v479_v48 }
  0xff   : > { %v466_v59 = vmax.f32 %v416_v54, 0.0  ;;  %v419_v60 = vadd.f32 %v1481_v35, %v418_v58  ;;  %1148 = vmatpush3.bf16.msra.mxu0 %v1251_v34  ;;  %v1258_v34 = vld [vmem:[%s1588_s3 + $0x78] sm:$0xff]  }
 0x100   : > { %v469_v61 = vmax.f32 %v427_v57, 0.0  ;;  %1149 = vmatprep.subr.bf16.mxu0 %v1252_v53 }
 0x101   : > { %v467_v63 = vmax.f32 %v419_v60, 0.0 }
 0x102   : > { %v481_v0 = vpack.c.bf16 %v469_v61, %v468_v56 }
 0x103   : > { %v480_v1 = vpack.c.bf16 %v467_v63, %v466_v59  ;;  %v1109_v2 = vpop.f32.mrb[8].mxu1  ;;  %1150 = vmatpush3.bf16.msra.mxu0 %v1252_v53 }
 0x104   : > { %v440_v3 = vadd.f32 %v1109_v2, %v1481_v35  ;;  %v431_v4 = vpop.f32.mrb[9].mxu1  ;;  %1151 = vmatprep.subr.bf16.mxu0 %v1253_v62 }
 0x105   : > { %1135 = vmatprep.mubr.bf16.mxu0 %v480_v1  ;;  %v432_v6 = vadd.f32 %v1481_v35, %v431_v4  ;;  %v1110_v7 = vpop.f32.mrb[10].mxu1 }
 0x106   : > { %1136 = vmatmul.mubr.bf16.gmra.mrb[4].mxu0 %v481_v0  ;;  %v472_v8 = vmax.f32 %v440_v3, 0.0  ;;  %v443_v9 = vadd.f32 %v1110_v7, %v1481_v35  ;;  %v434_v10 = vpop.f32.mrb[11].mxu1 }
 0x107   : > { %v470_v11 = vmax.f32 %v432_v6, 0.0  ;;  %v435_v12 = vadd.f32 %v1481_v35, %v434_v10  ;;  %1152 = vmatpush3.bf16.msra.mxu0 %v1253_v62 }
 0x108   : > { %v473_v13 = vmax.f32 %v443_v9, 0.0  ;;  %1153 = vmatprep.subr.bf16.mxu0 %v1254_v5 }
 0x109   : > { %v471_v15 = vmax.f32 %v435_v12, 0.0 }
 0x10a   : > { %v483_v16 = vpack.c.bf16 %v473_v13, %v472_v8 }
 0x10b   : > { %v482_v17 = vpack.c.bf16 %v471_v15, %v470_v11  ;;  %v1113_v18 = vpop.f32.mrb[12].mxu1  ;;  %1154 = vmatpush3.bf16.msra.mxu0 %v1254_v5 }
 0x10c   : > { %v456_v19 = vadd.f32 %v1113_v18, %v1481_v35  ;;  %v447_v20 = vpop.f32.mrb[13].mxu1  ;;  %1155 = vmatprep.subr.bf16.mxu0 %v1255_v14 }
 0x10d   : > { %1139 = vmatprep.mubr.bf16.mxu0 %v482_v17  ;;  %v448_v22 = vadd.f32 %v1481_v35, %v447_v20  ;;  %v1114_v23 = vpop.f32.mrb[14].mxu1 }
 0x10e   : > { %1140 = vmatmul.mubr.bf16.gmra.mrb[8].mxu0 %v483_v16  ;;  %v476_v24 = vmax.f32 %v456_v19, 0.0  ;;  %v459_v25 = vadd.f32 %v1114_v23, %v1481_v35  ;;  %v450_v26 = vpop.f32.mrb[15].mxu1 }
 0x10f   : > { %v474_v27 = vmax.f32 %v448_v22, 0.0  ;;  %v451_v28 = vadd.f32 %v1481_v35, %v450_v26  ;;  %1156 = vmatpush3.bf16.msra.mxu0 %v1255_v14  ;;  %v1009_v35 = vld [vmem:[%s1589_s4] ss:$0 sm:$0xff] }
 0x110   : > { %v477_v29 = vmax.f32 %v459_v25, 0.0  ;;  %1157 = vmatprep.subr.bf16.mxu0 %v1256_v21 }
 0x111   : > { %v475_v30 = vmax.f32 %v451_v28, 0.0  ;;  %v1323_v28 = vmov 0.0  }
 0x112   : > { %v485_v31 = vpack.c.bf16 %v477_v29, %v476_v24  ;;  %1179 = vmatprep.subr.bf16.mxu1 %v1323_v28  ;;  %1195 = vmatprep.mubr.msk.bf16.mxu1 %vm1324_vm1, %v1323_v28  ;;  %v873_v29 = vld [vmem:[#allocation2] sm:$0x1] }
 0x113   : > { %v484_v32 = vpack.c.bf16 %v475_v30, %v474_v27  ;;  %1158 = vmatpush3.bf16.msra.mxu0 %v1256_v21  ;;  %v1325_v30 = vmov 0  }
 0x114   : > { %1159 = vmatprep.subr.bf16.mxu0 %v1257_v33  ;;  %1241 = vset.pattern.permute.xlu0 %v1325_v30 }
 0x115   : > { %1143 = vmatprep.mubr.bf16.mxu0 %v484_v32  ;;  %876 = vperm.xlu0 %1241, %v873_v29  }
 0x116   : > { %1144 = vmatmul.mubr.bf16.gmra.mrb[12].mxu0 %v485_v31  ;;  %v1035_v31 = vld [vmem:[%s1589_s4 + $0x1] ss:$0 sm:$0xff] }
 0x117   : > { %1160 = vmatpush3.bf16.msra.mxu0 %v1257_v33 }
 0x118   : > { %1161 = vmatprep.subr.bf16.mxu0 %v1258_v34 }
 0x11b   : > { %1162 = vmatpush3.bf16.msra.mxu0 %v1258_v34 }
 0x194   : > { %v877_v29 = vpop.permute.xlu0 %876 }
 0x1d1   : > { %v1133_v36 = vpop.f32.mrb[0].mxu0 }
 0x1d2   : > { %v600_v37 = vadd.f32 %v1133_v36, %v1009_v35  ;;  %v591_v38 = vpop.f32.mrb[1].mxu0 }
 0x1d3   : > { %v592_v39 = vadd.f32 %v1009_v35, %v591_v38  ;;  %v1134_v40 = vpop.f32.mrb[2].mxu0 }
 0x1d4   : > { %v603_v41 = vadd.f32 %v1134_v40, %v1009_v35  ;;  %v594_v42 = vpop.f32.mrb[3].mxu0  ;;  %v656_v44 = vmax.f32 %v600_v37, 0.0 }
 0x1d5   : > { %v595_v43 = vadd.f32 %v1009_v35, %v594_v42  ;;  %v654_v46 = vmax.f32 %v592_v39, 0.0 }
 0x1d6   : > { %v657_v45 = vmax.f32 %v603_v41, 0.0 }
 0x1d7   : > { %v655_v47 = vmax.f32 %v595_v43, 0.0 }
 0x1d8   : > { %v671_v48 = vpack.c.bf16 %v657_v45, %v656_v44 }
 0x1d9   : > { %v670_v49 = vpack.c.bf16 %v655_v47, %v654_v46  ;;  %v1137_v50 = vpop.f32.mrb[4].mxu0 }
 0x1da   : > { %v616_v51 = vadd.f32 %v1137_v50, %v1009_v35  ;;  %v607_v52 = vpop.f32.mrb[5].mxu0 }
 0x1db   : > { %v608_v53 = vadd.f32 %v1009_v35, %v607_v52  ;;  %v1138_v54 = vpop.f32.mrb[6].mxu0  ;;  %1163 = vmatprep.mubr.bf16.mxu0 %v670_v49 }
 0x1dc   : > { %v660_v55 = vmax.f32 %v616_v51, 0.0  ;;  %v619_v56 = vadd.f32 %v1138_v54, %v1009_v35  ;;  %v610_v57 = vpop.f32.mrb[7].mxu0  ;;  %1164 = vmatmul.mubr.bf16.vlgmr.msra.gmra.mrb[16].mxu0 %v671_v48 }
 0x1dd   : > { %v658_v58 = vmax.f32 %v608_v53, 0.0  ;;  %v611_v59 = vadd.f32 %v1009_v35, %v610_v57 }
 0x1de   : > { %v661_v60 = vmax.f32 %v619_v56, 0.0 }
 0x1df   : > { %v659_v61 = vmax.f32 %v611_v59, 0.0 }
 0x1e0   : > { %v673_v62 = vpack.c.bf16 %v661_v60, %v660_v55 }
 0x1e1   : > { %v672_v63 = vpack.c.bf16 %v659_v61, %v658_v58  ;;  %v1141_v0 = vpop.f32.mrb[8].mxu0 }
 0x1e2   : > { %v632_v1 = vadd.f32 %v1141_v0, %v1009_v35  ;;  %v623_v2 = vpop.f32.mrb[9].mxu0 }
 0x1e3   : > { %1167 = vmatprep.mubr.bf16.mxu0 %v672_v63  ;;  %v624_v3 = vadd.f32 %v1009_v35, %v623_v2  ;;  %v1142_v4 = vpop.f32.mrb[10].mxu0 }
 0x1e4   : > { %1168 = vmatmul.mubr.bf16.gmra.mrb[20].mxu0 %v673_v62  ;;  %v664_v5 = vmax.f32 %v632_v1, 0.0  ;;  %v635_v6 = vadd.f32 %v1142_v4, %v1009_v35  ;;  %v626_v7 = vpop.f32.mrb[11].mxu0 }
 0x1e5   : > { %v662_v8 = vmax.f32 %v624_v3, 0.0  ;;  %v627_v9 = vadd.f32 %v1009_v35, %v626_v7 }
 0x1e6   : > { %v665_v10 = vmax.f32 %v635_v6, 0.0 }
 0x1e7   : > { %v663_v11 = vmax.f32 %v627_v9, 0.0 }
 0x1e8   : > { %v675_v12 = vpack.c.bf16 %v665_v10, %v664_v5 }
 0x1e9   : > { %v674_v13 = vpack.c.bf16 %v663_v11, %v662_v8  ;;  %v1145_v14 = vpop.f32.mrb[12].mxu0 }
 0x1ea   : > { %v648_v15 = vadd.f32 %v1145_v14, %v1009_v35  ;;  %v639_v16 = vpop.f32.mrb[13].mxu0 }
 0x1eb   : > { %1171 = vmatprep.mubr.bf16.mxu0 %v674_v13  ;;  %v640_v17 = vadd.f32 %v1009_v35, %v639_v16  ;;  %v1146_v18 = vpop.f32.mrb[14].mxu0 }
 0x1ec   : > { %1172 = vmatmul.mubr.bf16.gmra.mrb[24].mxu0 %v675_v12  ;;  %v668_v19 = vmax.f32 %v648_v15, 0.0  ;;  %v651_v20 = vadd.f32 %v1146_v18, %v1009_v35  ;;  %v642_v21 = vpop.f32.mrb[15].mxu0 }
 0x1ed   : > { %v666_v22 = vmax.f32 %v640_v17, 0.0  ;;  %v643_v23 = vadd.f32 %v1009_v35, %v642_v21 }
 0x1ee   : > { %v669_v24 = vmax.f32 %v651_v20, 0.0 }
 0x1ef   : > { %v667_v25 = vmax.f32 %v643_v23, 0.0 }
 0x1f0   : > { %v677_v26 = vpack.c.bf16 %v669_v24, %v668_v19  ;;  %v872_v24 = vld [vmem:[%s1590_s5] sm:$0x1] }
 0x1f1   : > { %v676_v27 = vpack.c.bf16 %v667_v25, %v666_v22  ;;  %v879_v25 = vlaneseq }
 0x1f3   : > { %1175 = vmatprep.mubr.bf16.mxu0 %v676_v27 }
 0x1f4   : > { %1176 = vmatmul.mubr.bf16.gmra.mrb[28].mxu0 %v677_v26  ;;  %v880_v26 = vshrl.u32 %v879_v25, 7 }
 0x1f6   : > { %v881_v27 = vsub.s32 0, %v880_v26 }
 0x1f8   : > { %v882_v30 = vrot.slane %v877_v29, %v881_v27 }
 0x2af   : > { %v1165_v32 = vpop.f32.mrb[16].mxu0 }
 0x2b0   : > { %v794_v33 = vadd.f32 %v1165_v32, %v1035_v31  ;;  %v785_v34 = vpop.f32.mrb[17].mxu0 }
 0x2b1   : > { %v786_v35 = vadd.f32 %v1035_v31, %v785_v34  ;;  %v1166_v36 = vpop.f32.mrb[18].mxu0 }
 0x2b2   : > { %v797_v37 = vadd.f32 %v1166_v36, %v1035_v31  ;;  %v788_v38 = vpop.f32.mrb[19].mxu0  ;;  %v850_v40 = vmax.f32 %v794_v33, 0.0 }
 0x2b3   : > { %v789_v39 = vadd.f32 %v1035_v31, %v788_v38  ;;  %v848_v42 = vmax.f32 %v786_v35, 0.0 }
 0x2b4   : > { %v851_v41 = vmax.f32 %v797_v37, 0.0 }
 0x2b5   : > { %v849_v43 = vmax.f32 %v789_v39, 0.0 }
 0x2b6   : > { %v865_v44 = vpack.c.bf16 %v851_v41, %v850_v40 }
 0x2b7   : > { %v864_v45 = vpack.c.bf16 %v849_v43, %v848_v42  ;;  %v1169_v46 = vpop.f32.mrb[20].mxu0 }
 0x2b8   : > { %v810_v47 = vadd.f32 %v1169_v46, %v1035_v31  ;;  %v801_v48 = vpop.f32.mrb[21].mxu0 }
 0x2b9   : > { %v802_v49 = vadd.f32 %v1035_v31, %v801_v48  ;;  %v1170_v50 = vpop.f32.mrb[22].mxu0  ;;  %1180 = vmatpush3.bf16.xpose.msra.mxu1 %v864_v45 }
 0x2ba   : > { %v813_v51 = vadd.f32 %v1170_v50, %v1035_v31  ;;  %v804_v52 = vpop.f32.mrb[23].mxu0  ;;  %1181 = vmatprep.subr.bf16.mxu1 %v1323_v28  ;;  %v854_v54 = vmax.f32 %v810_v47, 0.0 }
 0x2bb   : > { %v805_v53 = vadd.f32 %v1035_v31, %v804_v52  ;;  %v852_v56 = vmax.f32 %v802_v49, 0.0 }
 0x2bc   : > { %v855_v55 = vmax.f32 %v813_v51, 0.0 }
 0x2bd   : > { %v853_v57 = vmax.f32 %v805_v53, 0.0 }
 0x2be   : > { %v867_v58 = vpack.c.bf16 %v855_v55, %v854_v54 }
 0x2bf   : > { %v866_v59 = vpack.c.bf16 %v853_v57, %v852_v56  ;;  %v1173_v60 = vpop.f32.mrb[24].mxu0 }
 0x2c0   : > { %v826_v61 = vadd.f32 %v1173_v60, %v1035_v31  ;;  %v817_v62 = vpop.f32.mrb[25].mxu0 }
 0x2c1   : > { %1182 = vmatpush3.bf16.xpose.msra.mxu1 %v865_v44  ;;  %v818_v63 = vadd.f32 %v1035_v31, %v817_v62  ;;  %v1174_v0 = vpop.f32.mrb[26].mxu0 }
 0x2c2   : > { %v858_v1 = vmax.f32 %v826_v61, 0.0  ;;  %v829_v2 = vadd.f32 %v1174_v0, %v1035_v31  ;;  %v820_v3 = vpop.f32.mrb[27].mxu0  ;;  %1183 = vmatprep.subr.bf16.mxu1 %v1323_v28 }
 0x2c3   : > { %v856_v4 = vmax.f32 %v818_v63, 0.0  ;;  %v821_v5 = vadd.f32 %v1035_v31, %v820_v3 }
 0x2c4   : > { %v859_v6 = vmax.f32 %v829_v2, 0.0 }
 0x2c5   : > { %v857_v7 = vmax.f32 %v821_v5, 0.0 }
 0x2c6   : > { %v869_v8 = vpack.c.bf16 %v859_v6, %v858_v1 }
 0x2c7   : > { %v868_v9 = vpack.c.bf16 %v857_v7, %v856_v4  ;;  %v1177_v10 = vpop.f32.mrb[28].mxu0 }
 0x2c8   : > { %v842_v11 = vadd.f32 %v1177_v10, %v1035_v31  ;;  %v833_v12 = vpop.f32.mrb[29].mxu0 }
 0x2c9   : > { %1184 = vmatpush3.bf16.xpose.msra.mxu1 %v866_v59  ;;  %v834_v13 = vadd.f32 %v1035_v31, %v833_v12  ;;  %v1178_v14 = vpop.f32.mrb[30].mxu0 }
 0x2ca   : > { %1185 = vmatprep.subr.bf16.mxu1 %v1323_v28  ;;  %v862_v15 = vmax.f32 %v842_v11, 0.0  ;;  %v845_v16 = vadd.f32 %v1178_v14, %v1035_v31  ;;  %v836_v17 = vpop.f32.mrb[31].mxu0 }
 0x2cb   : > { %v860_v18 = vmax.f32 %v834_v13, 0.0  ;;  %v837_v19 = vadd.f32 %v1035_v31, %v836_v17 }
 0x2cc   : > { %v863_v20 = vmax.f32 %v845_v16, 0.0 }
 0x2cd   : > { %v861_v21 = vmax.f32 %v837_v19, 0.0 }
 0x2ce   : > { %v871_v22 = vpack.c.bf16 %v863_v20, %v862_v15 }
 0x2cf   : > { %v870_v23 = vpack.c.bf16 %v861_v21, %v860_v18 }
 0x2d1   : > { %1186 = vmatpush3.bf16.xpose.msra.mxu1 %v867_v58 }
 0x2d2   : > { %1187 = vmatprep.subr.bf16.mxu1 %v1323_v28 }
 0x2d9   : > { %1188 = vmatpush3.bf16.xpose.msra.mxu1 %v868_v9 }
 0x2da   : > { %1189 = vmatprep.subr.bf16.mxu1 %v1323_v28 }
 0x2e1   : > { %1190 = vmatpush3.bf16.xpose.msra.mxu1 %v869_v8 }
 0x2e2   : > { %1191 = vmatprep.subr.bf16.mxu1 %v1323_v28 }
 0x2e9   : > { %1192 = vmatpush3.bf16.xpose.msra.mxu1 %v870_v23 }
 0x2ea   : > { %1193 = vmatprep.subr.bf16.mxu1 %v1323_v28 }
 0x2f1   : > { %1194 = vmatpush3.bf16.xpose.msra.mxu1 %v871_v22 }
 0x2f8   : > { %1196 = vmatmul.mubr.bf16.vlgmr.msra.gmra.mrb[16].mxu1 %v872_v24 }
 0x3cb   : > { %v917_v31 = vpop.f32.mrb[16].mxu1 }
 0x3cc   : > { %v918_v32 = vadd.f32 %v917_v31, %v882_v30  ;;  %v1197_v33 = vpop.f32.mrb[17].mxu1 }
 0x3cd   : > { %v920_v28 = vpop.f32.mrb[18].mxu1 }
 0x3ce   : > { %v923_v34 = vmax.f32 %v918_v32, 0.0  ;;  %v1198_v35 = vpop.f32.mrb[19].mxu1 }
 0x3d0   : > { %924 = vst [vmem:[%s285_s18] sm:$0x1] %v923_v34 }
 0x3d1   : > { %1272 = shalt.err (!%p1269_p3)
}
 0x3d2   : > { %s1273_s16 = scalar_lea.hbm %s1543_s22, 16  ;;  %s1277_s14 = scalar_lea.hbm %s1592_s7, 32 }
 0x3d3   : > { %p1274_p4 = scmp.ne.s32.totalorder %s1543_s22, %s1273_s16  ;;  %p1278_p9 = scmp.lt.u32.totalorder %s1543_s22, %s1592_s7 }
 0x3d4   : > { %p1279_p10 = scmp.lt.u32.totalorder %s1277_s14, %s1273_s16  ;;  %p1281_p12 = scmp.lt.u32.totalorder %s1273_s16, %s1543_s22 }
 0x3d5   : > { %p1275_p7 = pnand %p1274_p4, %p1405_p5 }
 0x3d6   : > { %p1280_p11 = por %p1279_p10, %p1278_p9 }
 0x3d7   : > { %p1276_p8 = pneg %p1275_p7 }
 0x3d8   : > { %p1282_p13 = por %p1281_p12, %p1280_p11 }
 0x3da   : > { %p1283_p0 = pnand %p1282_p13, %p1276_p8 }
 0x3dc   : > { %1286 = shalt.err (!%p1283_p0)
}
 0x3dd   : > { %1199 = dma.vmem_to_hbm [thread:$0]  (%p1405_p5), %s1545_s19, 16, %s1543_s22, %s926_s23  }
 0x3de PF: > { %p1205_p1 = scmp.ge.s32.totalorder %s1321_s29, 2  ;;  %s950_s18 = sand.u32 1, %s1309_s26  }
 0x3df   : > { %s951_s20 = scalar_lea.sflag [#allocation4], %s950_s18 }
 0x3e0   : > { %p1202_p2 = pnand %p1205_p1, %p1409_p6 }
 0x3e2   : > { %1304 = dma.done.wait (!%p1202_p2), %s951_s20, 16  }
 0x3e3   : > { %1306 = vsyncadd (!%p1202_p2), %s951_s20, 4294967280  ;;  %p19_p3 = scmp.ge.s32.totalorder %s1393_s8, 4   ;;  %s1595_s26 = smov %s1313_s27 }
 0x3e4   : > { %s1596_s27 = smov %s1317_s28  ;;  %s1597_s28 = smov %s1403_s11 }
 0x3e5   : > { %s1598_s29 = smov %s1393_s8  ;;  %21 = sbr.rel (!%p19_p3) target bundleno = 6 (0x6), region = 85 }
 0x3ec   :  { %955 = vsyncpa [#allocation4], 1 }
 0x3ed   :  { %957 = vsyncpa [#allocation4 + $0x1], 1 }

</bundles_post_ra>
